<compile_context>
chip_gen: v5e
topology: v5e:2x2
jax: 0.10.0
libtpu: 0.0.40
codegen_flags: <defaults>
</compile_context>

<pallas_src>
import jax
import jax.numpy as jnp
from jax.experimental import pallas as pl
from jax.experimental.pallas import tpu as pltpu


def _round_up(x, m):
    return ((x + m - 1) // m) * m


def _cdiv(a, b):
    return (a + b - 1) // b


def _glove_loss_kernel(ce_ref, te_ref, aux_ref, out_ref):
    """One (tile_b, E) slab of the batch -> scalar partial loss.

    ce_ref, te_ref : (tile_b, E)     gathered center / target embeddings
    aux_ref        : (tile_b, 2)     col 0 = center_bias + target_bias - coocs
                                     col 1 = weighting (0 for padded rows)
    out_ref        : (1, 8, 128)     per-split partial sum (broadcast-filled),
                                     resident across the inner grid axis.
    """
    step = pl.program_id(1)

    @pl.when(step == 0)
    def _():
        out_ref[...] = jnp.zeros_like(out_ref)

    # Per-row dot product (the [B,1,E] x [B,E,1] bmm of the reference), f32.
    prod = ce_ref[...].astype(jnp.float32) * te_ref[...].astype(jnp.float32)
    ip = jnp.sum(prod, axis=-1, keepdims=True)            # (tile_b, 1)

    aux = aux_ref[...]                                     # (tile_b, 2)
    bias = aux[:, 0:1]                                     # cb + tb - coocs
    weight = aux[:, 1:2]                                   # weighting (0 on pad)
    diff = ip + bias

    # Collapse the whole tile to ONE scalar inside the step: no lane-padded
    # per-row accumulator, no per-step read-modify-write of a big scratch.
    step_loss = jnp.sum(weight * diff * diff, keepdims=True)   # (1, 1)

    # Broadcast-accumulate into the lane-dense resident output block.
    out_ref[...] += step_loss


def _auto_tile_rows(batch, emb, embed_bytes, num_splits, row_align,
                    target_bytes_per_step=2 << 20,
                    vmem_budget_bytes=20 << 20,
                    max_rows=4096):
    """Rows per grid step: ~2 MiB of HBM traffic per step, VMEM-capped."""
    hbm_bytes_per_row = 2 * emb * embed_bytes + 2 * 4
    rows = target_bytes_per_step // hbm_bytes_per_row
    # Double-buffered VMEM per row: two embedding streams (lane dim padded to
    # a multiple of 128) + the (rows, 2) aux block (lane-pads to 128, f32).
    e_pad = _round_up(max(emb, 128), 128)
    vmem_bytes_per_row = 2 * (2 * e_pad * embed_bytes) + 2 * (128 * 4)
    rows = min(rows, vmem_budget_bytes // vmem_bytes_per_row)
    rows = max(row_align, min(max_rows, rows))
    rows = (rows // row_align) * row_align
    b_pad = _round_up(batch, row_align)
    rows = min(rows, b_pad)
    # Guarantee >= num_splits grid steps so the leading "parallel" axis gives
    # every TensorCore (v7x megacore) work, when the batch is big enough.
    if num_splits > 1 and b_pad >= row_align * num_splits:
        while _cdiv(b_pad, rows) < num_splits and rows > row_align:
            rows = max(row_align, ((rows // 2) // row_align) * row_align)
    return rows


def glove_loss_pallas(center_embeds, target_embeds, aux, *,
                      tile_b=None, num_splits=2):
    """aux[:, 0] = center_bias + target_bias - coocs ; aux[:, 1] = weighting."""
    B, E = center_embeds.shape
    assert target_embeds.shape == (B, E)
    assert aux.shape == (B, 2)

    embed_bytes = jnp.dtype(center_embeds.dtype).itemsize
    row_align = 8 if embed_bytes >= 4 else (16 if embed_bytes == 2 else 32)

    if tile_b is None:
        tile_b = _auto_tile_rows(B, E, embed_bytes, num_splits, row_align)
    tile_b = max(row_align,
                 min(_round_up(tile_b, row_align), _round_up(B, row_align)))

    steps_total = _cdiv(B, tile_b)
    num_splits = max(1, min(num_splits, steps_total))
    steps = _cdiv(steps_total, num_splits)
    padded_b = steps * num_splits * tile_b

    if padded_b != B:
        pad = padded_b - B
        center_embeds = jnp.pad(center_embeds, ((0, pad), (0, 0)))
        target_embeds = jnp.pad(target_embeds, ((0, pad), (0, 0)))
        aux = jnp.pad(aux, ((0, pad), (0, 0)))   # weighting = 0 -> no contribution

    row_spec = pl.BlockSpec((tile_b, E), lambda c, i: (c * steps + i, 0))
    aux_spec = pl.BlockSpec((tile_b, 2), lambda c, i: (c * steps + i, 0))
    out_spec = pl.BlockSpec((1, 8, 128), lambda c, i: (c, 0, 0))

    cost = pl.CostEstimate(
        flops=padded_b * (2 * E + 5),
        transcendentals=0,
        bytes_accessed=padded_b * (2 * E * embed_bytes + 2 * 4)
                       + num_splits * 8 * 128 * 4,
    )

    partials = pl.pallas_call(
        _glove_loss_kernel,
        out_shape=jax.ShapeDtypeStruct((num_splits, 8, 128), jnp.float32),
        grid=(num_splits, steps),
        in_specs=[row_spec, row_spec, aux_spec],
        out_specs=out_spec,
        compiler_params=pltpu.CompilerParams(
            dimension_semantics=("parallel", "arbitrary"),
            vmem_limit_bytes=32 * 1024 * 1024,
        ),
        cost_estimate=cost,
    )(center_embeds, target_embeds, aux)

    # Every element of a split's (8, 128) block equals that split's partial.
    return jnp.sum(partials[:, 0, 0])


def glove_forward(params, center_words, target_words, coocs, weighting, *,
                  tile_b=None, num_splits=2, embed_dtype=None):
    """center_words/target_words: int32 [B, 1] (or [B]); coocs/weighting: f32 [B, 1]."""
    V, U, Vb, Ub = params
    c_ids = center_words.reshape(-1)
    t_ids = target_words.reshape(-1)
    coocs = coocs.reshape(-1, 1).astype(jnp.float32)
    weighting = weighting.reshape(-1, 1).astype(jnp.float32)

    # TODO(synk): fuse this gather into the kernel (scalar-prefetched ids +
    # DMA gather from pl.ANY tables) once E is large enough per row.
    center_embeds = jnp.take(V, c_ids, axis=0)   # [B, E]
    target_embeds = jnp.take(U, t_ids, axis=0)   # [B, E]
    if embed_dtype is not None:
        # Bandwidth lever: stream the dominant 2*B*E arrays at reduced
        # precision; the kernel upcasts and accumulates in f32.
        center_embeds = center_embeds.astype(embed_dtype)
        target_embeds = target_embeds.astype(embed_dtype)

    center_bias = jnp.take(Vb, c_ids, axis=0)    # [B, 1]
    target_bias = jnp.take(Ub, t_ids, axis=0)    # [B, 1]
    # Combine all column operands in the wrapper (free relative to the gather).
    bias = (center_bias + target_bias - coocs).astype(jnp.float32)
    aux = jnp.concatenate([bias, weighting], axis=-1)      # [B, 2]

    return glove_loss_pallas(center_embeds, target_embeds, aux,
                             tile_b=tile_b, num_splits=num_splits)


def _reference_loss(params, center_words, target_words, coocs, weighting,
                    embed_dtype=None):
    V, U, Vb, Ub = params
    c_ids = center_words.reshape(-1)
    t_ids = target_words.reshape(-1)
    ce = jnp.take(V, c_ids, axis=0)
    te = jnp.take(U, t_ids, axis=0)
    if embed_dtype is not None:
        ce = ce.astype(embed_dtype)
        te = te.astype(embed_dtype)
    ce = ce.astype(jnp.float32)
    te = te.astype(jnp.float32)
    cb = jnp.take(Vb, c_ids, axis=0)
    tb = jnp.take(Ub, t_ids, axis=0)
    ip = jnp.sum(ce * te, axis=-1, keepdims=True)
    return jnp.sum(weighting.reshape(-1, 1)
                   * (ip + cb + tb - coocs.reshape(-1, 1)) ** 2)


if __name__ == "__main__":
    vocab_size = 50
    emb_size = 32

    key = jax.random.PRNGKey(0)
    k_v, k_u, k_vb, k_ub = jax.random.split(key, 4)
    V = jax.random.normal(k_v, (vocab_size, emb_size), dtype=jnp.float32)
    U = jax.random.normal(k_u, (vocab_size, emb_size), dtype=jnp.float32)
    Vb = jax.random.normal(k_vb, (vocab_size, 1), dtype=jnp.float32)
    Ub = jax.random.normal(k_ub, (vocab_size, 1), dtype=jnp.float32)
    params = (V, U, Vb, Ub)

    def make_batch(seed, batch):
        kc, kt, ko, kw = jax.random.split(jax.random.PRNGKey(seed), 4)
        cw = jax.random.randint(kc, (batch, 1), 0, vocab_size, dtype=jnp.int32)
        tw = jax.random.randint(kt, (batch, 1), 0, vocab_size, dtype=jnp.int32)
        co = jax.random.uniform(ko, (batch, 1), dtype=jnp.float32) * 5.0
        w = jax.random.uniform(kw, (batch, 1), dtype=jnp.float32)
        return cw, tw, co, w

    # --- Test 1: small batch, auto tiling (adaptive split keeps 2 grid steps). ---
    cw, tw, co, w = make_batch(1, 16)
    loss = jax.block_until_ready(glove_forward(params, cw, tw, co, w))
    ref = _reference_loss(params, cw, tw, co, w)
    assert jnp.allclose(loss, ref, rtol=1e-4, atol=1e-4), (loss, ref)

    # --- Test 2: batch not divisible by the tile, multi-step + 2-way split
    #     (exercises zero padding, per-step accumulation, per-split partials). ---
    cw, tw, co, w = make_batch(2, 200)
    loss = jax.block_until_ready(
        glove_forward(params, cw, tw, co, w, tile_b=64, num_splits=2))
    ref = _reference_loss(params, cw, tw, co, w)
    assert jnp.allclose(loss, ref, rtol=1e-4, atol=1e-4), (loss, ref)

    # --- Test 3: bf16 streaming of the embedding arrays, f32 accumulation. ---
    cw, tw, co, w = make_batch(3, 64)
    loss = jax.block_until_ready(
        glove_forward(params, cw, tw, co, w, embed_dtype=jnp.bfloat16))
    ref = _reference_loss(params, cw, tw, co, w, embed_dtype=jnp.bfloat16)
    assert jnp.allclose(loss, ref, rtol=1e-3, atol=1e-3), (loss, ref)

    print("KERNEL_OK")
</pallas_src>

<mosaic_0001>
module attributes {stable_mosaic.version = 11 : i64} {
  func.func @_glove_loss_kernel(%arg0: i32, %arg1: i32, %arg2: memref<8x32xf32, #tpu.memory_space<vmem>>, %arg3: memref<8x32xf32, #tpu.memory_space<vmem>>, %arg4: memref<8x2xf32, #tpu.memory_space<vmem>>, %arg5: memref<1x8x128xf32, #tpu.memory_space<vmem>>) attributes {dimension_semantics = [#tpu.dimension_semantics<parallel>, #tpu.dimension_semantics<arbitrary>], iteration_bounds = array<i64: 2, 1>, scalar_prefetch = 0 : i64, scratch_operands = 0 : i64, tpu.core_type = #tpu.core_type<tc>, window_params = [{transform_indices = @transform_0, window_bounds = array<i64: 8, 32>}, {transform_indices = @transform_1, window_bounds = array<i64: 8, 32>}, {transform_indices = @transform_2, window_bounds = array<i64: 8, 2>}, {transform_indices = @transform_3, window_bounds = array<i64: 1, 8, 128>}]} {
    %c0_i32 = arith.constant 0 : i32
    %0 = arith.cmpi eq, %arg1, %c0_i32 : i32
    %1 = arith.extui %0 : i1 to i32
    %c0_i32_0 = arith.constant 0 : i32
    %2 = arith.cmpi ne, %1, %c0_i32_0 : i32
    scf.if %2 {
      %cst_13 = arith.constant 0.000000e+00 : f32
      %24 = vector.broadcast %cst_13 : f32 to vector<1x8x128xf32>
      %c0_14 = arith.constant 0 : index
      %c0_15 = arith.constant 0 : index
      %c0_16 = arith.constant 0 : index
      %25 = vector.load %arg5[%c0_14, %c0_15, %c0_16] : memref<1x8x128xf32, #tpu.memory_space<vmem>>, vector<1x8x128xf32>
      tpu.vector_store %arg5[%c0_14, %c0_15, %c0_16], %24 {strides = array<i32>} : memref<1x8x128xf32, #tpu.memory_space<vmem>>, vector<1x8x128xf32>,
    } else {
    }
    %c0 = arith.constant 0 : index
    %c0_1 = arith.constant 0 : index
    %3 = vector.load %arg2[%c0, %c0_1] : memref<8x32xf32, #tpu.memory_space<vmem>>, vector<8x32xf32>
    %c0_2 = arith.constant 0 : index
    %c0_3 = arith.constant 0 : index
    %4 = vector.load %arg3[%c0_2, %c0_3] : memref<8x32xf32, #tpu.memory_space<vmem>>, vector<8x32xf32>
    %5 = arith.mulf %3, %4 : vector<8x32xf32>
    %cst = arith.constant dense<0.000000e+00> : vector<8xf32>
    %6 = vector.multi_reduction <add>, %5, %cst [1] : vector<8x32xf32> to vector<8xf32>
    %7 = vector.shape_cast %6 : vector<8xf32> to vector<8x1xf32>
    %c0_4 = arith.constant 0 : index
    %c0_5 = arith.constant 0 : index
    %8 = vector.load %arg4[%c0_4, %c0_5] : memref<8x2xf32, #tpu.memory_space<vmem>>, vector<8x2xf32>
    %9 = vector.extract_strided_slice %8 {offsets = [0, 0], sizes = [8, 1], strides = [1, 1]} : vector<8x2xf32> to vector<8x1xf32>
    %10 = vector.extract_strided_slice %8 {offsets = [0, 1], sizes = [8, 1], strides = [1, 1]} : vector<8x2xf32> to vector<8x1xf32>
    %11 = arith.addf %7, %9 : vector<8x1xf32>
    %12 = arith.mulf %10, %11 : vector<8x1xf32>
    %13 = arith.mulf %12, %11 : vector<8x1xf32>
    %14 = vector.shape_cast %13 : vector<8x1xf32> to vector<1x8x1xf32>
    %cst_6 = arith.constant dense<0.000000e+00> : vector<1xf32>
    %15 = vector.multi_reduction <add>, %14, %cst_6 [1, 2] : vector<1x8x1xf32> to vector<1xf32>
    %16 = vector.shape_cast %15 : vector<1xf32> to vector<1x1x1xf32>
    %17 = vector.extract %16[0, 0, 0] : f32 from vector<1x1x1xf32>
    %18 = vector.broadcast %17 : f32 to vector<1x1xf32>
    %c0_7 = arith.constant 0 : index
    %c0_8 = arith.constant 0 : index
    %c0_9 = arith.constant 0 : index
    %19 = vector.load %arg5[%c0_7, %c0_8, %c0_9] : memref<1x8x128xf32, #tpu.memory_space<vmem>>, vector<1x8x128xf32>
    %20 = vector.shape_cast %18 : vector<1x1xf32> to vector<1x1x1xf32>
    %21 = vector.broadcast %20 : vector<1x1x1xf32> to vector<1x8x128xf32>
    %22 = arith.addf %19, %21 : vector<1x8x128xf32>
    %c0_10 = arith.constant 0 : index
    %c0_11 = arith.constant 0 : index
    %c0_12 = arith.constant 0 : index
    %23 = vector.load %arg5[%c0_10, %c0_11, %c0_12] : memref<1x8x128xf32, #tpu.memory_space<vmem>>, vector<1x8x128xf32>
    tpu.vector_store %arg5[%c0_10, %c0_11, %c0_12], %22 {strides = array<i32>} : memref<1x8x128xf32, #tpu.memory_space<vmem>>, vector<1x8x128xf32>,
    return
  }
  func.func @transform_0(%arg0: i32, %arg1: i32) -> (i32, i32) {
    %c1_i32 = arith.constant 1 : i32
    %0 = arith.muli %arg0, %c1_i32 : i32
    %1 = arith.addi %0, %arg1 : i32
    %c0_i32 = arith.constant 0 : i32
    %c0_i32_0 = arith.constant 0 : i32
    return %1, %c0_i32 : i32, i32
  }
  func.func @transform_1(%arg0: i32, %arg1: i32) -> (i32, i32) {
    %c1_i32 = arith.constant 1 : i32
    %0 = arith.muli %arg0, %c1_i32 : i32
    %1 = arith.addi %0, %arg1 : i32
    %c0_i32 = arith.constant 0 : i32
    %c0_i32_0 = arith.constant 0 : i32
    return %1, %c0_i32 : i32, i32
  }
  func.func @transform_2(%arg0: i32, %arg1: i32) -> (i32, i32) {
    %c1_i32 = arith.constant 1 : i32
    %0 = arith.muli %arg0, %c1_i32 : i32
    %1 = arith.addi %0, %arg1 : i32
    %c0_i32 = arith.constant 0 : i32
    %c0_i32_0 = arith.constant 0 : i32
    return %1, %c0_i32 : i32, i32
  }
  func.func @transform_3(%arg0: i32, %arg1: i32) -> (i32, i32, i32) {
    %c0_i32 = arith.constant 0 : i32
    %c0_i32_0 = arith.constant 0 : i32
    %c0_i32_1 = arith.constant 0 : i32
    return %arg0, %c0_i32, %c0_i32_0 : i32, i32, i32
  }
}

</mosaic_0001>

<bundles_post_ra>
// kernel: tpu_custom_call.1
= control target key start
LH: loop header
LB: loop body
LE: loop exit
PB: predicated region body
PF: predicated region fallthrough
CT: control target
= control target key end

     0   :  { %8 = vsyncpa [#allocation3], 0  ;;  %s760_s0 = inlined_call_operand.vmem [shape: f32[16,32], index: 0, kind: input, shape index: {}]   ;;  %s761_s1 = inlined_call_operand.hbm [shape: f32[16,32], index: 1, kind: input, shape index: {}]   ;;  %s762_s2 = inlined_call_operand.vmem [shape: f32[16,2], index: 2, kind: input, shape index: {}]   ;;  %s763_s3 = inlined_call_operand.hbm [shape: f32[2,8,128], index: 3, kind: output, shape index: {}]  }
   0x1   :  { %10 = vsyncpa [#allocation3 + $0x1], 0 }
   0x2   :  { %11 = vsyncpa [#allocation4], 0 }
   0x3   :  { %13 = vsyncpa [#allocation4 + $0x1], 0  ;;  %s628_s12 = smov 0   ;;  %s630_s13 = smov 0  }
   0x4   :  { %s632_s14 = smov 0   ;;  %s634_s15 = smov 0  }
   0x5   :  { %s636_s16 = smov 0   ;;  %s638_s17 = smov 0  }
   0x6 LB: > { %s410_s18 = sadd.s32 4294967295, %s604_s17   ;;  %s411_s19 = sadd.s32 4294967294, %s604_s17   ;;  %s604_s17 = sphi %s638_s17, %s19_s17   ;;  %s600_s16 = sphi %s636_s16, %s772_s16   ;;  %s596_s15 = sphi %s634_s15, %s771_s15   ;;  %s592_s14 = sphi %s632_s14, %s770_s14   ;;  %s588_s13 = sphi %s630_s13, %s769_s13   ;;  %s584_s12 = sphi %s628_s12, %s768_s12  }
   0x7   : > { %s31_s20 = sadd.s32 1, %s600_s16  ;;  %s68_s21 = sadd.s32 1, %s592_s14 }
   0x8   : > { %p33_p0 = scmp.ge.s32.totalorder %s31_s20, 2  ;;  %p75_p1 = scmp.ne.s32.totalorder %s592_s14, %s588_s13 }
   0x9   : > { %p76_p2 = scmp.eq.s32.totalorder %s604_s17, 0  ;;  %p81_p3 = scmp.ne.s32.totalorder %s588_s13, %s584_s12 }
   0xa   : > { %s774_s20 = smov (%p33_p0, %s31_s20), 0  ;;  %p82_p5 = scmp.eq.s32.totalorder %s410_s18, 0 }
   0xb   : > { %p669_p4 = por %p76_p2, %p75_p1  ;;  %s65_s23 = ssub.s32 %s600_s16, %s774_s20 }
   0xc   : > { %p133_p6 = scmp.eq.s32.totalorder %s410_s18, 1  ;;  %p66_p7 = scmp.eq.s32.totalorder %s65_s23, 0 }
   0xd   : > { %p675_p8 = por %p82_p5, %p81_p3  ;;  %p139_p10 = scmp.eq.s32.totalorder %s411_s19, 1 }
   0xe   : > { %p679_p9 = por %p133_p6, %p75_p1  ;;  %p413_p12 = scmp.ge.s32.totalorder %s604_s17, 2 }
   0xf   : > { %s684_s26 = scalar_select %p66_p7, %s592_s14, %s68_s21  }
  0x10   : > { %p686_p11 = por %p139_p10, %p81_p3  ;;  %p439_p13 = scmp.lt.s32.totalorder %s604_s17, 2 }
  0x11   : > { %s168_s28 = sand.u32 1, %s592_s14   ;;  %s415_s30 = sshll.u32 %s600_s16, 3 }
  0x12   : > { %s414_s29 = sshll.u32 %s168_s28, 3  ;;  %s177_s6 = scalar_lea.hbm %s761_s1, %s415_s30 }
  0x13   : > { %s172_s7 = scalar_lea.vmem [#allocation2], %s414_s29  ;;  %s179_s9 = sshll.u32 %s177_s6, 4  ;;  %s180_s9 = int_to_ptr.hbm [resolvable:$true] %s179_s9 }
  0x14   : > { %s181_s8 = sshll.u32 %s172_s7, 4  ;;  %p432_p0 = pnand %p439_p13, %p669_p4  ;;  %s182_s8 = int_to_ptr.vmem [resolvable:$true] %s181_s8 }
  0x15   : > { %p416_p1 = scmp.ge.s32.totalorder %s604_s17, 1  ;;  %p195_p2 = scmp.lt.s32.totalorder %s604_s17, 3 }
  0x16   : > { %s169_s10 = scalar_lea.sflag [#allocation3], %s168_s28 }
  0x17   : > { %434 = dma.hbm_to_vmem [thread:$0]  (!%p432_p0), %s180_s9, 128, %s182_s8, %s169_s10  }
  0x18   : > { %p196_p3 = pnand %p416_p1, %p195_p2 }
  0x19   : > { %s702_s11 = sand.u32 (!%p196_p3), 1, %s588_s13  }
  0x1a   : > { %199 = sbr.rel (%p196_p3) target bundleno = 577 (0x241), region = 32  ;;  %s417_s18 = sshll.u32 (!%p196_p3), %s702_s11, 3 }
  0x1b   : > { %s202_s19 = scalar_lea.sflag (!%p196_p3), [#allocation3], %s702_s11  ;;  %s205_s21 = scalar_lea.vmem (!%p196_p3), [#allocation2], %s417_s18 }
  0x1f   : > { %575 = dma.done.wait (%p675_p8), %s202_s19, 128  }
  0x20   : > { %577 = vsyncadd (%p675_p8), %s202_s19, 4294967168  ;;  %p240_p4 = scmp.lt.s32.totalorder %s596_s15, 1  ;;  %v258_v1 = vld [vmem:[%s205_s21] sm:$0xff]  ;;  %vm260_vm0 = vcmask 261120   ;;  %s606_s6 = smov 1   ;;  %vm276_vm1 = vcmask 7168  }
  0x21   : > { %s607_s7 = smov 127   ;;  %s422_s8 = sshll.u32 %s596_s15, 3 }
  0x22   : > { %s241_s22 = scalar_select %p240_p4, %s596_s15, 1 }
  0x23   : > { %s302_s19 = scalar_lea.hbm %s763_s3, %s422_s8  ;;  %s238_s21 = scalar_lea.vmem [#allocation5], %s417_s18 }
  0x24   : > { %s419_s23 = sshll.u32 %s241_s22, 3  ;;  %s304_s22 = sshll.u32 %s238_s21, 4  ;;  %s305_s22 = int_to_ptr.vmem [resolvable:$true] %s304_s22 }
  0x25   : > { %s243_s30 = scalar_lea.vmem %s760_s0, %s419_s23  ;;  %s250_s24 = scalar_lea.vmem %s762_s2, %s419_s23 }
  0x26   : > { %v257_v0 = vld [vmem:[%s243_s30] sm:$0xff]  ;;  %s306_s23 = sshll.u32 %s302_s19, 4  ;;  %s292_s29 = scalar_lea.sflag [#allocation4], %s702_s11  ;;  %s307_s23 = int_to_ptr.hbm [resolvable:$true] %s306_s23 }
  0x27   : > { %v259_v2 = vmul.f32 %v258_v1, %v257_v0  ;;  %v264_v4 = vld [vmem:[%s250_s24] sm:$0xff]  ;;  %s536_s30 = sshra.s32 %s307_s23, 4  ;;  %s542_s24 = scalar_lea.hbm %s763_s3, 16  ;;  %s537_s30 = int_to_ptr.hbm [resolvable:$true] %s536_s30 }
  0x28   : > { %s538_s4 = scalar_lea.hbm %s537_s30, 8  ;;  %p543_p8 = scmp.lt.s32.totalorder %s537_s30, %s763_s3 }
  0x29   : > { %v261_v3 = vsel %vm260_vm0, %v259_v2, 0.0  ;;  %p539_p5 = scmp.ne.s32.totalorder %s537_s30, %s538_s4  ;;  %p544_p10 = scmp.lt.s32.totalorder %s542_s24, %s538_s4 }
  0x2a   : > { %262 = vadd.xlane.f32.xlu0 %v261_v3 }
  0x2b   : > { %p540_p6 = pnand %p539_p5, %p679_p9  ;;  %p545_p13 = por %p544_p10, %p543_p8 }
  0x2d   : > { %p541_p7 = pneg %p540_p6 }
  0x2f   : > { %p546_p0 = pnand %p545_p13, %p541_p7 }
  0x9d   : > { %v263_v5 = vpop.xlane.xlu0 %262 }
  0x9e   : > { %v265_v6 = vadd.f32 %v264_v4, %v263_v5 }
  0xa0   : > { %267 = vrot.lane.b32.xlu0 %v265_v6, %s606_s6 }
 0x112   : > { %v268_v7 = vpop.permute.xlu0 %267 }
 0x113   : > { %v270_v8 = vmul.f32 %v268_v7, %v264_v4 }
 0x115   : > { %v271_v9 = vmul.f32 %v270_v8, %v268_v7 }
 0x117   : > { %273 = vrot.lane.b32.xlu1 %v271_v9, %s607_s7 }
 0x189   : > { %v274_v10 = vpop.permute.xlu1 %273 }
 0x18a   : > { %v277_v11 = vsel %vm276_vm1, %v274_v10, 0.0 }
 0x18b   : > { %278 = vadd.xlane.f32.xlu1 %v277_v11 }
 0x1fe   : > { %v279_v12 = vpop.xlane.xlu1 %278 }
 0x1ff   : > { %v280_v13 = vrot.slane %v279_v12, 4 }
 0x201   : > { %v281_v14 = vadd.f32 %v280_v13, %v279_v12 }
 0x203   : > { %v282_v15 = vrot.slane %v281_v14, 2 }
 0x205   : > { %v283_v16 = vadd.f32 %v282_v15, %v281_v14 }
 0x207   : > { %v284_v17 = vrot.slane %v283_v16, 1 }
 0x209   : > { %v285_v18 = vadd.f32 %v284_v17, %v283_v16 }
 0x20b   : > { %425 = vpush %v285_v18 }
 0x23c   : > { %s426_s28 = spop %425 }
 0x23d   : > { %v288_v19 = vstv %s426_s28 }
 0x23e   : > { %290 = vst [vmem:[%s238_s21] sm:$0xff] %v288_v19 }
 0x23f   : > { %549 = shalt.err (!%p546_p0)
}
 0x240   : > { %429 = dma.vmem_to_hbm [thread:$0]  (%p679_p9), %s305_s22, 128, %s307_s23, %s292_s29  }
 0x241 PF: > { %s318_s11 = sand.u32 1, %s584_s12   ;;  %p436_p1 = pnand %p413_p12, %p686_p11 }
 0x242   : > { %s319_s7 = scalar_lea.sflag [#allocation4], %s318_s11 }
 0x243   : > { %p437_p2 = pneg %p436_p1 }
 0x245   : > { %579 = dma.done.wait (%p437_p2), %s319_s7, 128  }
 0x246   : > { %581 = vsyncadd (%p437_p2), %s319_s7, 4294967168  ;;  %s19_s17 = sadd.s32 1, %s604_s17   ;;  %s768_s12 = smov %s588_s13 }
 0x247   : > { %p16_p3 = scmp.ge.s32.totalorder %s19_s17, 4   ;;  %s769_s13 = smov %s592_s14 }
 0x248   : > { %s770_s14 = smov %s684_s26  ;;  %s771_s15 = smov %s600_s16 }
 0x249   : > { %s772_s16 = smov %s774_s20  ;;  %18 = sbr.rel (!%p16_p3) target bundleno = 6 (0x6), region = 87 }
 0x24e   :  { %325 = vsyncpa [#allocation3], 1 }
 0x24f   :  { %327 = vsyncpa [#allocation3 + $0x1], 1 }
 0x250   :  { %328 = vsyncpa [#allocation4], 1 }
 0x251   :  { %330 = vsyncpa [#allocation4 + $0x1], 1 }

</bundles_post_ra>
